<compile_context>
chip_gen: v7x
topology: tpu7x:2x2x1
jax: 0.10.0
libtpu: 0.0.40
codegen_flags: <defaults>
</compile_context>

<pallas_src>
import jax
import jax.numpy as jnp
from jax.experimental import pallas as pl
from jax.experimental.pallas import tpu as pltpu


def _identity_kernel(x_ref, o_ref):
    # Straight copy of the current VMEM row-strip.
    o_ref[...] = x_ref[...]


def _pick_tile_rows(n_rows, row_bytes, itemsize, max_tile_bytes=2 * 1024 * 1024):
    """Choose a row-strip height for (tile_rows, C) blocks.

    - Full-extent blocks are exempt from the (8,128) divisibility rule, so when no
      clean divisor exists we fall back to a single full-array block (no padding).
    - Row multiple follows the dtype's sublane packing (f32->8, bf16->16, int8->32)
      so loads/stores stay full-vreg and stores stay unmasked.
    - Tiles are capped at ~2 MiB: with input+output double-buffered that is <= 8 MiB
      of VMEM, safely under the default scoped VMEM on v5e (16 MiB), v6e and v7x.
    """
    row_multiple = 8 * max(1, 4 // max(itemsize, 1))
    if n_rows < row_multiple:
        return n_rows                                   # single full-extent block
    cap = max(row_multiple, max_tile_bytes // max(row_bytes, 1))
    cap = min(cap, n_rows)
    cap -= cap % row_multiple
    t = cap
    while t >= row_multiple:
        if n_rows % t == 0:                             # largest aligned divisor
            return t
        t -= row_multiple
    return n_rows                                       # ragged rows -> one full block


def identity_forward(x):
    """Identity forward: returns x unchanged (same shape & dtype) through a tiled,
    input-aliased Pallas copy kernel (kept only for API symmetry with the module)."""
    orig_shape = x.shape
    orig_dtype = x.dtype

    if x.size == 0:
        return x

    # Flatten to a 2D (rows, features) slab; reshape of a contiguous array is
    # layout metadata only — no extra HBM traffic.
    if x.ndim == 0:
        x2d = x.reshape(1, 1)
    elif x.ndim == 1:
        x2d = x.reshape(1, -1)
    else:
        x2d = x.reshape(-1, x.shape[-1])

    R, C = x2d.shape
    itemsize = jnp.dtype(orig_dtype).itemsize
    tile_rows = _pick_tile_rows(R, C * itemsize, itemsize)
    grid = (R // tile_rows,)

    out = pl.pallas_call(
        _identity_kernel,
        out_shape=jax.ShapeDtypeStruct((R, C), orig_dtype),
        grid_spec=pltpu.PrefetchScalarGridSpec(
            num_scalar_prefetch=0,
            grid=grid,
            # Row-strip blocks spanning the full feature (lane) axis: one contiguous,
            # lane-dense DMA per step; no jnp.pad and no out[:R,:C] slice needed.
            in_specs=[pl.BlockSpec((tile_rows, C), lambda i: (i, 0))],
            out_specs=pl.BlockSpec((tile_rows, C), lambda i: (i, 0)),
        ),
        # Output aliases the input HBM buffer: no new allocation, in-place pass-through.
        input_output_aliases={0: 0},
        # Pure-bandwidth hint so XLA's scheduler overlaps neighbors instead of
        # treating this as opaque compute.
        cost_estimate=pl.CostEstimate(
            flops=0, transcendentals=0, bytes_accessed=2 * R * C * itemsize
        ),
        compiler_params=pltpu.CompilerParams(
            # Shards the (single) grid axis across v7x's 2 TensorCores; no-op on v5e/v6e.
            dimension_semantics=("parallel",),
        ),
    )(x2d)

    return out.reshape(orig_shape)


class IdentityPallas:
    """Mirror of the PyTorch Identity module."""

    def __init__(self, n_output):
        self.n_output = n_output  # no parameters

    def get_features(self, x, **kwargs):
        return identity_forward(x)

    def __call__(self, x, **kwargs):
        return self.get_features(x)


if __name__ == "__main__":
    key = jax.random.PRNGKey(0)

    # Small shape matching the module's (batch, n_output) feature convention.
    batch, n_output = 2, 32
    x = jax.random.normal(key, (batch, n_output), dtype=jnp.float32)

    model = IdentityPallas(n_output=n_output)
    y = jax.block_until_ready(model(x))
    assert y.shape == x.shape and y.dtype == x.dtype
    assert bool(jnp.all(y == x))

    # Exercise the multi-step row-strip path as well (tile_rows divides rows).
    x2 = jax.random.normal(jax.random.PRNGKey(1), (64, 256), dtype=jnp.float32)
    y2 = jax.block_until_ready(identity_forward(x2))
    assert y2.shape == x2.shape and bool(jnp.all(y2 == x2))

    print("KERNEL_OK")
</pallas_src>

<mosaic_0001>
module attributes {stable_mosaic.version = 11 : i64} {
  func.func @_identity_kernel(%arg0: i32, %arg1: memref<2x32xf32, #tpu.memory_space<vmem>>, %arg2: memref<2x32xf32, #tpu.memory_space<vmem>>) attributes {dimension_semantics = [#tpu.dimension_semantics<parallel>], iteration_bounds = array<i64: 1>, scalar_prefetch = 0 : i64, scratch_operands = 0 : i64, tpu.core_type = #tpu.core_type<tc>, window_params = [{transform_indices = @transform_0, window_bounds = array<i64: 2, 32>}, {transform_indices = @transform_1, window_bounds = array<i64: 2, 32>}]} {
    %c0 = arith.constant 0 : index
    %c0_0 = arith.constant 0 : index
    %0 = vector.load %arg1[%c0, %c0_0] : memref<2x32xf32, #tpu.memory_space<vmem>>, vector<2x32xf32>
    %c0_1 = arith.constant 0 : index
    %c0_2 = arith.constant 0 : index
    %1 = vector.load %arg2[%c0_1, %c0_2] : memref<2x32xf32, #tpu.memory_space<vmem>>, vector<2x32xf32>
    tpu.vector_store %arg2[%c0_1, %c0_2], %0 {strides = array<i32>} : memref<2x32xf32, #tpu.memory_space<vmem>>, vector<2x32xf32>,
    return
  }
  func.func @transform_0(%arg0: i32) -> (i32, i32) {
    %c0_i32 = arith.constant 0 : i32
    %c0_i32_0 = arith.constant 0 : i32
    return %arg0, %c0_i32 : i32, i32
  }
  func.func @transform_1(%arg0: i32) -> (i32, i32) {
    %c0_i32 = arith.constant 0 : i32
    %c0_i32_0 = arith.constant 0 : i32
    return %arg0, %c0_i32 : i32, i32
  }
}

</mosaic_0001>

<bundles_post_ra>
// kernel: tpu_custom_call.1
= control target key start
LH: loop header
LB: loop body
LE: loop exit
PB: predicated region body
PF: predicated region fallthrough
CT: control target
= control target key end

     0   :  { %6 = vsyncpa [#allocation3], 0  ;;  %s125_s0 = inlined_call_operand.hbm [shape: f32[2,32], index: 0, kind: input, shape index: {}, may-alias: {0,1}]   ;;  %s126_s1 = inlined_call_operand.hbm [shape: f32[2,32], index: 1, kind: output, shape index: {}, may-alias: {0,1}]  }
   0x1   :  { %7 = vsyncpa [#allocation4], 0  ;;  %s89_s6 = smov [#allocation2]   ;;  %s41_s10 = scalar_lea.hbm %s125_s0, 32 }
   0x2   :  { %s14_s7 = sshll.u32 %s89_s6, 4  ;;  %p42_p0 = scmp.ne.s32.totalorder %s125_s0, %s41_s10  ;;  %s15_s7 = int_to_ptr.vmem [resolvable:$true] %s14_s7 }
   0x3   :  { %p45_p1 = scmp.lt.u32.totalorder %s41_s10, %s125_s0 }
   0x5   :  { %p47_p2 = pnand %p45_p1, %p42_p0 }
   0x7   :  { %50 = shalt.err (!%p47_p2)
}
   0x8   :  { %s51_s15 = scalar_lea.vmem %s15_s7, 32  ;;  %p56_p4 = scmp.lt.s32.totalorder %s15_s7, %s15_s7 }
   0x9   :  { %p52_p3 = scmp.ne.s32.totalorder %s15_s7, %s51_s15  ;;  %p57_p5 = scmp.lt.s32.totalorder %s51_s15, %s51_s15 }
   0xb   :  { %p58_p6 = por %p57_p5, %p56_p4 }
   0xd   :  { %p59_p7 = pnand %p58_p6, %p52_p3 }
   0xf   :  { %62 = shalt.err (!%p59_p7)
}
  0x10   :  { %17 = dma.hbm_to_vmem [thread:$0]  %s125_s0, 32, %s15_s7, [#allocation3]  }
  0x11   :  { %85 = dma.done.wait [#allocation3], 32  }
  0x12   :  { %86 = vsyncadd [#allocation3], 4294967264  ;;  %s90_s18 = smov [#allocation5]   ;;  %vm22_vm0 = vcmask 254976   ;;  %v21_v0 = vld [vmem:[#allocation2] sm:$0x3] }
  0x13   :  { %s30_s19 = sshll.u32 %s90_s18, 4  ;;  %23 = vst.msk [vmem:[#allocation5] sm:$0x3] %vm22_vm0, %v21_v0  ;;  %s31_s19 = int_to_ptr.vmem [resolvable:$true] %s30_s19 }
  0x14   :  { %s63_s20 = scalar_lea.vmem %s31_s19, 32  ;;  %p68_p9 = scmp.lt.s32.totalorder %s31_s19, %s31_s19 }
  0x15   :  { %p64_p8 = scmp.ne.s32.totalorder %s31_s19, %s63_s20  ;;  %p69_p10 = scmp.lt.s32.totalorder %s63_s20, %s63_s20 }
  0x17   :  { %p70_p11 = por %p69_p10, %p68_p9 }
  0x19   :  { %p71_p12 = pnand %p70_p11, %p64_p8 }
  0x1b   :  { %74 = shalt.err (!%p71_p12)
}
  0x1c   :  { %s75_s23 = scalar_lea.hbm %s126_s1, 32 }
  0x1d   :  { %p76_p13 = scmp.ne.s32.totalorder %s126_s1, %s75_s23  ;;  %p79_p0 = scmp.lt.u32.totalorder %s75_s23, %s126_s1 }
  0x1f   :  { %p81_p1 = pnand %p79_p0, %p76_p13 }
  0x21   :  { %84 = shalt.err (!%p81_p1)
}
  0x22   :  { %33 = dma.vmem_to_hbm [thread:$0]  %s31_s19, 32, %s126_s1, [#allocation4]  }
  0x23   :  { %87 = dma.done.wait [#allocation4], 32  }
  0x24   :  { %88 = vsyncadd [#allocation4], 4294967264 }
  0x25   :  { %37 = vsyncpa [#allocation3], 1 }
  0x26   :  { %38 = vsyncpa [#allocation4], 1 }

</bundles_post_ra>
